<compile_context>
chip_gen: v6e
topology: v6e:2x2x1
jax: 0.10.0
libtpu: 0.0.40
codegen_flags: <defaults>
</compile_context>

<pallas_src>
import jax
import jax.numpy as jnp
from jax.experimental import pallas as pl
from jax.experimental.pallas import tpu as pltpu


def _round_up(n, m):
    return ((n + m - 1) // m) * m


def sill_kernel(x_ref, c_ref, s_ref, seg_ref, wx_ref, wg_ref, o_ref):
    # x_ref  : (TB, ROWW)   batch tile; state vector tiled P times along lanes
    # c_ref  : (R, ROWW)    packed centers      (fill value +1e30 -> contributes 0)
    # s_ref  : (R, ROWW)    packed steepnesses  (fill value 1.0)
    # seg_ref: (ROWW, PC)   0/1 lane -> local-log segment matrix (shared by all rows)
    # wx_ref : (ROWW, KP)   Koopman rows for the raw state (replica-0 lanes only)
    # wg_ref : (R, PC, KP)  Koopman rows for the conjLogs of each packed row
    #                       (the dummy constant-1 log carries the Koopman bias row)
    # o_ref  : (TB, KP)     lane-dense output tile
    xp = x_ref[...]                                            # (TB, ROWW)
    seg = seg_ref[...]                                         # (ROWW, PC)

    # Raw-state part of the Koopman product (the bias rides in via the dummy log).
    out = jnp.dot(xp, wx_ref[...], preferred_element_type=jnp.float32)

    n_rows = c_ref.shape[0]   # R = ceil((L+1)/P): small -> unrolled Python loop.
    for r in range(n_rows):
        c_r = c_ref[pl.ds(r, 1), :]                            # (1, ROWW)
        s_r = s_ref[pl.ds(r, 1), :]                            # (1, ROWW)
        z = s_r * (xp - c_r)                                   # (TB, ROWW)
        # Stable softplus: log(1 + exp(z)) = max(z, 0) + log(1 + exp(-|z|))
        sp = jnp.maximum(z, 0.0) + jnp.log(1.0 + jnp.exp(-jnp.abs(z)))
        # Segmented sum over each log's D lanes -> per-log log-denominator (MXU).
        logsum = jnp.dot(sp, seg, preferred_element_type=jnp.float32)   # (TB, PC)
        # prod_d 1/(1+exp(z)) = exp(-sum_d softplus(z))  -- no divide, no overflow.
        g = jnp.exp(-logsum)                                   # (TB, PC)
        out = out + jnp.dot(g, wg_ref[r], preferred_element_type=jnp.float32)

    o_ref[...] = out.astype(o_ref.dtype)


def sill_forward(x, centers, steepnesses, koopman_w, *, batch_tile=None):
    """SILL_Model.forward.

    x:           (B, D)
    centers:     (L, D)   stacked conjLog centers
    steepnesses: (L, D)   stacked conjLog steepnesses
    koopman_w:   (K, K)   nn.Linear weight, K = 1 + D + L   (y = lifted @ W.T)
    returns:     (B, K)
    """
    B, D = x.shape
    L = centers.shape[0]
    K = 1 + D + L
    assert koopman_w.shape == (K, K)
    f32 = jnp.float32

    # ---- packing geometry --------------------------------------------------
    if D <= 128:
        P = max(1, 128 // D)            # conjLogs packed per 128-lane row
        ROWW = 128
    else:
        P = 1
        ROWW = _round_up(D, 128)
    LE = L + 1                          # + dummy constant-1 log (Koopman bias row)
    R = -(-LE // P)                     # number of packed rows
    PC = _round_up(P, 8)                # per-row log columns, sublane aligned
    KP = _round_up(K, 128)              # lane-dense output width

    # ---- batch tiling --------------------------------------------------------
    if batch_tile is None:
        TB = min(256, _round_up(B, 8))
        # v7x has 2 TensorCores: once there is enough work, make sure the
        # "parallel" batch grid has at least 2 steps.
        if B >= 128 and -(-B // TB) < 2:
            TB = _round_up(-(-B // 2), 8)
    else:
        TB = batch_tile
    BP = _round_up(B, TB)

    BIG = 1e30   # softplus(1 * (x - 1e30)) == 0 exactly -> padding contributes 0

    wt = koopman_w.astype(f32).T        # (K, K); forward == lifted @ wt

    # x tiled P times along lanes: lane p*D + d  <-  x[:, d]
    x_tiled = jnp.tile(x.astype(f32), (1, P))                               # (B, P*D)
    x_pack = jnp.zeros((BP, ROWW), f32).at[:B, :P * D].set(x_tiled)

    # Packed centers / steepnesses: row r, lanes p*D..p*D+D-1 hold conjLog r*P+p.
    c_full = jnp.full((R * P, D), BIG, f32).at[:L].set(centers.astype(f32))
    s_full = jnp.ones((R * P, D), f32).at[:L].set(steepnesses.astype(f32))
    c_pack = jnp.full((R, ROWW), BIG, f32).at[:, :P * D].set(c_full.reshape(R, P * D))
    s_pack = jnp.ones((R, ROWW), f32).at[:, :P * D].set(s_full.reshape(R, P * D))

    # 0/1 segment matrix: lane p*D + d (d < D) -> local column p.
    lane = jnp.arange(ROWW)
    seg = ((lane[:, None] < P * D)
           & ((lane[:, None] // D) == jnp.arange(PC)[None, :])).astype(f32)

    # Koopman rows for the raw state, read off the replica-0 lanes of x_pack.
    w_x = jnp.zeros((ROWW, KP), f32).at[:D, :K].set(wt[1:1 + D, :])

    # Koopman rows for the conjLogs of each packed row; the dummy log (index L)
    # evaluates to exactly 1, so its row is the Koopman weight for the "1" feature.
    wg_rows = jnp.zeros((R * P, K), f32)
    wg_rows = wg_rows.at[:L].set(wt[1 + D:1 + D + L, :])
    wg_rows = wg_rows.at[L].set(wt[0, :])
    w_g = jnp.zeros((R, PC, KP), f32).at[:, :P, :K].set(wg_rows.reshape(R, P, K))

    # Advisory cost estimate (helps XLA schedule around the custom call).
    flops = (2 * BP * ROWW * KP
             + R * (2 * BP * ROWW * PC + 2 * BP * PC * KP + 6 * BP * ROWW))
    transcendentals = R * BP * (2 * ROWW + PC)
    bytes_accessed = 4 * (BP * ROWW + BP * KP + 2 * R * ROWW
                          + ROWW * PC + ROWW * KP + R * PC * KP)

    out = pl.pallas_call(
        sill_kernel,
        out_shape=jax.ShapeDtypeStruct((BP, KP), f32),
        grid=(BP // TB,),
        in_specs=[
            pl.BlockSpec((TB, ROWW), lambda i: (i, 0)),
            # Grid-invariant operands (index_map always (0, 0)): DMA'd once and
            # kept resident across grid steps.  (pl.Buffered(1) would also drop
            # the second pipeline buffer; skipped -- these arrays are tiny.)
            pl.BlockSpec((R, ROWW), lambda i: (0, 0)),
            pl.BlockSpec((R, ROWW), lambda i: (0, 0)),
            pl.BlockSpec((ROWW, PC), lambda i: (0, 0)),
            pl.BlockSpec((ROWW, KP), lambda i: (0, 0)),
            pl.BlockSpec((R, PC, KP), lambda i: (0, 0, 0)),
        ],
        out_specs=pl.BlockSpec((TB, KP), lambda i: (i, 0)),
        compiler_params=pltpu.CompilerParams(
            dimension_semantics=("parallel",),
        ),
        cost_estimate=pl.CostEstimate(
            flops=int(flops),
            transcendentals=int(transcendentals),
            bytes_accessed=int(bytes_accessed),
        ),
    )(x_pack, c_pack, s_pack, seg, w_x, w_g)

    return out[:B, :K]


if __name__ == "__main__":
    key = jax.random.PRNGKey(0)
    k_x, k_c, k_s, k_w = jax.random.split(key, 4)

    B, D, L = 8, 32, 7          # batch, state dim, number of conjLog dictionary fns
    K = 1 + D + L               # Koopman (lifted) dimension

    x = jax.random.normal(k_x, (B, D), dtype=jnp.float32)
    # nn.init.uniform_(param, 0, 10) for every conjLog
    centers = jax.random.uniform(k_c, (L, D), dtype=jnp.float32, minval=0.0, maxval=10.0)
    steepnesses = jax.random.uniform(k_s, (L, D), dtype=jnp.float32, minval=0.0, maxval=10.0)
    # kaiming_normal_ on the (K, K) Koopman weight: std = sqrt(2 / fan_in)
    koopman_w = jax.random.normal(k_w, (K, K), dtype=jnp.float32) * jnp.sqrt(2.0 / K)

    out = sill_forward(x, centers, steepnesses, koopman_w)
    out = jax.block_until_ready(out)

    # Pure-JAX reference of the PyTorch forward (naive form).
    z = steepnesses[None, :, :] * (x[:, None, :] - centers[None, :, :])    # (B, L, D)
    individuals = 1.0 / (1.0 + jnp.exp(z))
    g = jnp.prod(individuals, axis=-1)                                      # (B, L)
    lifted = jnp.concatenate([jnp.ones((B, 1), jnp.float32), x, g], axis=1)
    ref = jnp.dot(lifted, koopman_w.T, precision=jax.lax.Precision.HIGHEST)

    assert out.shape == (B, K)
    assert bool(jnp.all(jnp.isfinite(out)))
    err = float(jnp.max(jnp.abs(out - ref)))
    assert jnp.allclose(out, ref, atol=2e-3, rtol=2e-3), err

    print("KERNEL_OK")
</pallas_src>

<mosaic_0001>
module attributes {stable_mosaic.version = 11 : i64} {
  func.func @sill_kernel(%arg0: i32, %arg1: memref<8x128xf32, #tpu.memory_space<vmem>>, %arg2: memref<2x128xf32, #tpu.memory_space<vmem>>, %arg3: memref<2x128xf32, #tpu.memory_space<vmem>>, %arg4: memref<128x8xf32, #tpu.memory_space<vmem>>, %arg5: memref<128x128xf32, #tpu.memory_space<vmem>>, %arg6: memref<2x8x128xf32, #tpu.memory_space<vmem>>, %arg7: memref<8x128xf32, #tpu.memory_space<vmem>>) attributes {dimension_semantics = [#tpu.dimension_semantics<parallel>], iteration_bounds = array<i64: 1>, scalar_prefetch = 0 : i64, scratch_operands = 0 : i64, tpu.core_type = #tpu.core_type<tc>, window_params = [{transform_indices = @transform_0, window_bounds = array<i64: 8, 128>}, {pipeline_mode = #tpu.pipeline_mode<synchronous>, transform_indices = @transform_1, window_bounds = array<i64: 2, 128>}, {pipeline_mode = #tpu.pipeline_mode<synchronous>, transform_indices = @transform_2, window_bounds = array<i64: 2, 128>}, {pipeline_mode = #tpu.pipeline_mode<synchronous>, transform_indices = @transform_3, window_bounds = array<i64: 128, 8>}, {pipeline_mode = #tpu.pipeline_mode<synchronous>, transform_indices = @transform_4, window_bounds = array<i64: 128, 128>}, {pipeline_mode = #tpu.pipeline_mode<synchronous>, transform_indices = @transform_5, window_bounds = array<i64: 2, 8, 128>}, {transform_indices = @transform_6, window_bounds = array<i64: 8, 128>}]} {
    %c0 = arith.constant 0 : index
    %c0_0 = arith.constant 0 : index
    %0 = vector.load %arg1[%c0, %c0_0] : memref<8x128xf32, #tpu.memory_space<vmem>>, vector<8x128xf32>
    %c0_1 = arith.constant 0 : index
    %c0_2 = arith.constant 0 : index
    %1 = vector.load %arg4[%c0_1, %c0_2] : memref<128x8xf32, #tpu.memory_space<vmem>>, vector<128x8xf32>
    %c0_3 = arith.constant 0 : index
    %c0_4 = arith.constant 0 : index
    %2 = vector.load %arg5[%c0_3, %c0_4] : memref<128x128xf32, #tpu.memory_space<vmem>>, vector<128x128xf32>
    %cst = arith.constant dense<0.000000e+00> : vector<8x128xf32>
    %3 = tpu.matmul %0, %2, %cst {dimension_numbers = #tpu.dot_dimension_numbers<[1], [0], [0], [1], [0, 0, 1, 1], [], []>} : vector<8x128xf32>, vector<128x128xf32>, vector<8x128xf32> -> vector<8x128xf32>
    %c0_5 = arith.constant 0 : index
    %c0_6 = arith.constant 0 : index
    %4 = vector.load %arg2[%c0_5, %c0_6] : memref<2x128xf32, #tpu.memory_space<vmem>>, vector<1x128xf32>
    %c0_7 = arith.constant 0 : index
    %c0_8 = arith.constant 0 : index
    %5 = vector.load %arg3[%c0_7, %c0_8] : memref<2x128xf32, #tpu.memory_space<vmem>>, vector<1x128xf32>
    %6 = vector.broadcast %4 : vector<1x128xf32> to vector<8x128xf32>
    %7 = arith.subf %0, %6 : vector<8x128xf32>
    %8 = vector.broadcast %5 : vector<1x128xf32> to vector<8x128xf32>
    %9 = arith.mulf %8, %7 : vector<8x128xf32>
    %cst_9 = arith.constant 0.000000e+00 : f32
    %10 = vector.broadcast %cst_9 : f32 to vector<8x128xf32>
    %11 = arith.maximumf %9, %10 : vector<8x128xf32>
    %12 = math.absf %9 : vector<8x128xf32>
    %cst_10 = arith.constant 0.000000e+00 : f32
    %13 = vector.broadcast %cst_10 : f32 to vector<8x128xf32>
    %14 = arith.subf %13, %12 : vector<8x128xf32>
    %15 = math.exp %14 : vector<8x128xf32>
    %cst_11 = arith.constant 1.000000e+00 : f32
    %16 = vector.broadcast %cst_11 : f32 to vector<8x128xf32>
    %17 = arith.addf %16, %15 : vector<8x128xf32>
    %18 = math.log %17 : vector<8x128xf32>
    %19 = arith.addf %11, %18 : vector<8x128xf32>
    %cst_12 = arith.constant dense<0.000000e+00> : vector<8x8xf32>
    %20 = tpu.matmul %19, %1, %cst_12 {dimension_numbers = #tpu.dot_dimension_numbers<[1], [0], [0], [1], [0, 0, 1, 1], [], []>} : vector<8x128xf32>, vector<128x8xf32>, vector<8x8xf32> -> vector<8x8xf32>
    %cst_13 = arith.constant 0.000000e+00 : f32
    %21 = vector.broadcast %cst_13 : f32 to vector<8x8xf32>
    %22 = arith.subf %21, %20 : vector<8x8xf32>
    %23 = math.exp %22 : vector<8x8xf32>
    %c0_14 = arith.constant 0 : index
    %c0_15 = arith.constant 0 : index
    %c0_16 = arith.constant 0 : index
    %24 = vector.load %arg6[%c0_14, %c0_15, %c0_16] : memref<2x8x128xf32, #tpu.memory_space<vmem>>, vector<1x8x128xf32>
    %25 = vector.shape_cast %24 : vector<1x8x128xf32> to vector<8x128xf32>
    %cst_17 = arith.constant dense<0.000000e+00> : vector<8x128xf32>
    %26 = tpu.matmul %23, %25, %cst_17 {dimension_numbers = #tpu.dot_dimension_numbers<[1], [0], [0], [1], [0, 0, 1, 1], [], []>} : vector<8x8xf32>, vector<8x128xf32>, vector<8x128xf32> -> vector<8x128xf32>
    %27 = arith.addf %3, %26 : vector<8x128xf32>
    %c1 = arith.constant 1 : index
    %c0_18 = arith.constant 0 : index
    %28 = vector.load %arg2[%c1, %c0_18] : memref<2x128xf32, #tpu.memory_space<vmem>>, vector<1x128xf32>
    %c1_19 = arith.constant 1 : index
    %c0_20 = arith.constant 0 : index
    %29 = vector.load %arg3[%c1_19, %c0_20] : memref<2x128xf32, #tpu.memory_space<vmem>>, vector<1x128xf32>
    %30 = vector.broadcast %28 : vector<1x128xf32> to vector<8x128xf32>
    %31 = arith.subf %0, %30 : vector<8x128xf32>
    %32 = vector.broadcast %29 : vector<1x128xf32> to vector<8x128xf32>
    %33 = arith.mulf %32, %31 : vector<8x128xf32>
    %cst_21 = arith.constant 0.000000e+00 : f32
    %34 = vector.broadcast %cst_21 : f32 to vector<8x128xf32>
    %35 = arith.maximumf %33, %34 : vector<8x128xf32>
    %36 = math.absf %33 : vector<8x128xf32>
    %cst_22 = arith.constant 0.000000e+00 : f32
    %37 = vector.broadcast %cst_22 : f32 to vector<8x128xf32>
    %38 = arith.subf %37, %36 : vector<8x128xf32>
    %39 = math.exp %38 : vector<8x128xf32>
    %cst_23 = arith.constant 1.000000e+00 : f32
    %40 = vector.broadcast %cst_23 : f32 to vector<8x128xf32>
    %41 = arith.addf %40, %39 : vector<8x128xf32>
    %42 = math.log %41 : vector<8x128xf32>
    %43 = arith.addf %35, %42 : vector<8x128xf32>
    %cst_24 = arith.constant dense<0.000000e+00> : vector<8x8xf32>
    %44 = tpu.matmul %43, %1, %cst_24 {dimension_numbers = #tpu.dot_dimension_numbers<[1], [0], [0], [1], [0, 0, 1, 1], [], []>} : vector<8x128xf32>, vector<128x8xf32>, vector<8x8xf32> -> vector<8x8xf32>
    %cst_25 = arith.constant 0.000000e+00 : f32
    %45 = vector.broadcast %cst_25 : f32 to vector<8x8xf32>
    %46 = arith.subf %45, %44 : vector<8x8xf32>
    %47 = math.exp %46 : vector<8x8xf32>
    %c1_26 = arith.constant 1 : index
    %c0_27 = arith.constant 0 : index
    %c0_28 = arith.constant 0 : index
    %48 = vector.load %arg6[%c1_26, %c0_27, %c0_28] : memref<2x8x128xf32, #tpu.memory_space<vmem>>, vector<1x8x128xf32>
    %49 = vector.shape_cast %48 : vector<1x8x128xf32> to vector<8x128xf32>
    %cst_29 = arith.constant dense<0.000000e+00> : vector<8x128xf32>
    %50 = tpu.matmul %47, %49, %cst_29 {dimension_numbers = #tpu.dot_dimension_numbers<[1], [0], [0], [1], [0, 0, 1, 1], [], []>} : vector<8x8xf32>, vector<8x128xf32>, vector<8x128xf32> -> vector<8x128xf32>
    %51 = arith.addf %27, %50 : vector<8x128xf32>
    %c0_30 = arith.constant 0 : index
    %c0_31 = arith.constant 0 : index
    %52 = vector.load %arg7[%c0_30, %c0_31] : memref<8x128xf32, #tpu.memory_space<vmem>>, vector<8x128xf32>
    tpu.vector_store %arg7[%c0_30, %c0_31], %51 {strides = array<i32>} : memref<8x128xf32, #tpu.memory_space<vmem>>, vector<8x128xf32>,
    return
  }
  func.func @transform_0(%arg0: i32) -> (i32, i32) {
    %c0_i32 = arith.constant 0 : i32
    %c0_i32_0 = arith.constant 0 : i32
    return %arg0, %c0_i32 : i32, i32
  }
  func.func @transform_1(%arg0: i32) -> (i32, i32) {
    %c0_i32 = arith.constant 0 : i32
    %c0_i32_0 = arith.constant 0 : i32
    %c0_i32_1 = arith.constant 0 : i32
    return %c0_i32, %c0_i32_0 : i32, i32
  }
  func.func @transform_2(%arg0: i32) -> (i32, i32) {
    %c0_i32 = arith.constant 0 : i32
    %c0_i32_0 = arith.constant 0 : i32
    %c0_i32_1 = arith.constant 0 : i32
    return %c0_i32, %c0_i32_0 : i32, i32
  }
  func.func @transform_3(%arg0: i32) -> (i32, i32) {
    %c0_i32 = arith.constant 0 : i32
    %c0_i32_0 = arith.constant 0 : i32
    %c0_i32_1 = arith.constant 0 : i32
    return %c0_i32, %c0_i32_0 : i32, i32
  }
  func.func @transform_4(%arg0: i32) -> (i32, i32) {
    %c0_i32 = arith.constant 0 : i32
    %c0_i32_0 = arith.constant 0 : i32
    %c0_i32_1 = arith.constant 0 : i32
    return %c0_i32, %c0_i32_0 : i32, i32
  }
  func.func @transform_5(%arg0: i32) -> (i32, i32, i32) {
    %c0_i32 = arith.constant 0 : i32
    %c0_i32_0 = arith.constant 0 : i32
    %c0_i32_1 = arith.constant 0 : i32
    %c0_i32_2 = arith.constant 0 : i32
    return %c0_i32, %c0_i32_0, %c0_i32_1 : i32, i32, i32
  }
  func.func @transform_6(%arg0: i32) -> (i32, i32) {
    %c0_i32 = arith.constant 0 : i32
    %c0_i32_0 = arith.constant 0 : i32
    return %arg0, %c0_i32 : i32, i32
  }
}

</mosaic_0001>

<bundles_post_ra>
// kernel: tpu_custom_call.1
= control target key start
LH: loop header
LB: loop body
LE: loop exit
PB: predicated region body
PF: predicated region fallthrough
CT: control target
= control target key end

     0   :  { %11 = vsyncpa [#allocation3], 0  ;;  %s1057_s0 = inlined_call_operand.hbm [shape: f32[8,128], index: 0, kind: input, shape index: {}]   ;;  %s1058_s1 = inlined_call_operand.hbm [shape: f32[2,128], index: 1, kind: input, shape index: {}]   ;;  %s1059_s2 = inlined_call_operand.hbm [shape: f32[2,128], index: 2, kind: input, shape index: {}]   ;;  %s1060_s3 = inlined_call_operand.vmem [shape: f32[128,8], index: 3, kind: input, shape index: {}]   ;;  %s1061_s4 = inlined_call_operand.vmem [shape: f32[128,128], index: 4, kind: input, shape index: {}]   ;;  %s1062_s5 = inlined_call_operand.vmem [shape: f32[2,8,128], index: 5, kind: input, shape index: {}]   ;;  %s1063_s6 = inlined_call_operand.hbm [shape: f32[8,128], index: 6, kind: output, shape index: {}]  }
   0x1   :  { %12 = vsyncpa [#allocation6], 0 }
   0x2   :  { %13 = vsyncpa [#allocation4], 0  ;;  %s799_s21 = smov [#allocation5]   ;;  %s800_s23 = smov [#allocation2]  }
   0x3   :  { %s30_s22 = sshll.u32 %s799_s21, 4  ;;  %s20_s24 = sshll.u32 %s800_s23, 4  ;;  %s31_s22 = int_to_ptr.vmem [resolvable:$true] %s30_s22  ;;  %s21_s24 = int_to_ptr.vmem [resolvable:$true] %s20_s24 }
   0x4   :  { %s721_s25 = scalar_lea.vmem %s31_s22, 32  ;;  %p726_p1 = scmp.lt.s32.totalorder %s31_s22, %s31_s22 }
   0x5   :  { %p722_p0 = scmp.ne.s32.totalorder %s31_s22, %s721_s25  ;;  %p727_p2 = scmp.lt.s32.totalorder %s721_s25, %s721_s25 }
   0x7   :  { %p728_p3 = por %p727_p2, %p726_p1 }
   0x9   :  { %p729_p4 = pnand %p728_p3, %p722_p0 }
   0xb   :  { %732 = shalt.err (!%p729_p4)
}
   0xc   :  { %33 = dma.hbm_to_vmem [thread:$0]  %s1058_s1, 32, %s31_s22, [#allocation6]  }
   0xd   :  { %s741_s28 = scalar_lea.vmem %s21_s24, 128  ;;  %p746_p6 = scmp.lt.s32.totalorder %s21_s24, %s21_s24 }
   0xe   :  { %p742_p5 = scmp.ne.s32.totalorder %s21_s24, %s741_s28  ;;  %p747_p7 = scmp.lt.s32.totalorder %s741_s28, %s741_s28 }
  0x10   :  { %p748_p8 = por %p747_p7, %p746_p6 }
  0x12   :  { %p749_p9 = pnand %p748_p8, %p742_p5 }
  0x14   :  { %752 = shalt.err (!%p749_p9)
}
  0x15   :  { %23 = dma.hbm_to_vmem [thread:$0]  %s1057_s0, 128, %s21_s24, [#allocation3]  }
  0x16   :  { %s801_s7 = smov [#allocation7]  }
  0x17   :  { %s40_s8 = sshll.u32 %s801_s7, 4  ;;  %s41_s8 = int_to_ptr.vmem [resolvable:$true] %s40_s8 }
  0x18   :  { %s761_s9 = scalar_lea.vmem %s41_s8, 32  ;;  %p766_p11 = scmp.lt.s32.totalorder %s41_s8, %s41_s8 }
  0x19   :  { %p762_p10 = scmp.ne.s32.totalorder %s41_s8, %s761_s9  ;;  %p767_p12 = scmp.lt.s32.totalorder %s761_s9, %s761_s9 }
  0x1b   :  { %p768_p13 = por %p767_p12, %p766_p11 }
  0x1d   :  { %p769_p0 = pnand %p768_p13, %p762_p10 }
  0x1f   :  { %772 = shalt.err (!%p769_p0)
}
  0x20   :  { %43 = dma.hbm_to_vmem [thread:$0]  %s1059_s2, 32, %s41_s8, [#allocation6]  }
  0x21   :  { %793 = dma.done.wait [#allocation3], 128  }
  0x22   :  { %794 = vsyncadd [#allocation3], 4294967168 }
  0x23   :  { %795 = dma.done.wait [#allocation6], 64  }
  0x24   :  { %796 = vsyncadd [#allocation6], 4294967232  ;;  %v802_v0 = vmov 0.0   ;;  %vm803_vm0 = vmmov 0   ;;  %v858_v1 = vld [vmem:[%s1060_s3 + $0x78] sm:$0xff]  ;;  %v863_v2 = vld [vmem:[%s1060_s3 + $0x70] sm:$0xff] }
  0x25   :  { %580 = vmatprep.subr.mxu0 %v802_v0  ;;  %612 = vmatprep.mubr.msk.f32.mxu0 %vm803_vm0, %v802_v0  ;;  %v870_v3 = vld [vmem:[%s1060_s3 + $0x68] sm:$0xff]  ;;  %v877_v4 = vld [vmem:[%s1060_s3 + $0x60] sm:$0xff]  ;;  %v886_v7 = vld [vmem:[%s1060_s3 + $0x58] sm:$0xff]  ;;  %vm187_vm1 = vcmask 64512  }
  0x26   :  { %615 = vmatprep.subr.mxu1 %v802_v0  ;;  %617 = vmatprep.mubr.msk.f32.mxu1 %vm803_vm0, %v802_v0  ;;  %v880_v5 = vld [vmem:[#allocation2] sm:$0xff]  ;;  %v518_v6 = vld [vmem:[#allocation5] ss:$0 sm:$0xff]  ;;  %v519_v8 = vld [vmem:[#allocation7] ss:$0 sm:$0xff] }
  0x27   :  { %581 = vmatpush3.msra.mxu0 %v858_v1  ;;  %v98_v9 = vsub.f32 %v880_v5, %v518_v6  ;;  %v894_v10 = vld [vmem:[%s1060_s3 + $0x50] sm:$0xff]  ;;  %v901_v12 = vld [vmem:[%s1060_s3 + $0x48] sm:$0xff]  ;;  %v908_v14 = vld [vmem:[%s1060_s3 + $0x40] sm:$0xff] }
  0x28   :  { %582 = vmatprep.subr.mxu0 %v802_v0  ;;  %v915_v16 = vld [vmem:[%s1060_s3 + $0x38] sm:$0xff]  ;;  %v521_v18 = vld [vmem:[#allocation5 + $0x1] ss:$0 sm:$0xff]  ;;  %v66_v19 = vld [vmem:[%s1060_s3 + $0x30] sm:$0xff] }
  0x29   :  { %583 = vmatpush3.msra.mxu0 %v863_v2  ;;  %v103_v11 = vmul.f32 %v519_v8, %v98_v9  ;;  %v65_v20 = vld [vmem:[%s1060_s3 + $0x28] sm:$0xff]  ;;  %v337_v21 = vsub.f32 %v880_v5, %v521_v18  ;;  %v64_v23 = vld [vmem:[%s1060_s3 + $0x20] sm:$0xff]  ;;  %v63_v24 = vld [vmem:[%s1060_s3 + $0x18] sm:$0xff] }
  0x2a   :  { %584 = vmatprep.subr.mxu0 %v802_v0  ;;  %v522_v22 = vld [vmem:[#allocation7 + $0x1] ss:$0 sm:$0xff]  ;;  %v62_v26 = vld [vmem:[%s1060_s3 + $0x10] sm:$0xff]  ;;  %v60_v29 = vld [vmem:[%s1060_s3] sm:$0xff] }
  0x2b   :  { %585 = vmatpush3.msra.mxu0 %v870_v3  ;;  %v105_v13 = vand.u32 2147483647, %v103_v11  ;;  %v342_v25 = vmul.f32 %v522_v22, %v337_v21  ;;  %v61_v27 = vld [vmem:[%s1060_s3 + $0x8] sm:$0xff]  ;;  %v104_v34 = vmax.f32 %v103_v11, 0.0  ;;  %v186_v44 = vld [vmem:[%s1062_s5] sm:$0xff]  ;;  %v91_v49 = vld [vmem:[%s1061_s4 + $0x78] sm:$0xff] }
  0x2c   :  { %586 = vmatprep.subr.mxu0 %v802_v0  ;;  %616 = vmatpush3.msra.mxu1 %v186_v44  ;;  %v90_v51 = vld [vmem:[%s1061_s4 + $0x70] sm:$0xff]  ;;  %v89_v52 = vld [vmem:[%s1061_s4 + $0x68] sm:$0xff]  ;;  %v88_v53 = vld [vmem:[%s1061_s4 + $0x60] sm:$0xff] }
  0x2d   :  { %587 = vmatpush3.msra.mxu0 %v877_v4  ;;  %v106_v15 = vsub.f32 0.0, %v105_v13  ;;  %v344_v28 = vand.u32 2147483647, %v342_v25  ;;  %v343_v41 = vmax.f32 %v342_v25, 0.0  ;;  %620 = vmatprep.subr.mxu1 %v802_v0  ;;  %v87_v54 = vld [vmem:[%s1061_s4 + $0x58] sm:$0xff]  ;;  %v86_v55 = vld [vmem:[%s1061_s4 + $0x50] sm:$0xff] }
  0x2e   :  { %588 = vmatprep.subr.mxu0 %v802_v0  ;;  %v85_v56 = vld [vmem:[%s1061_s4 + $0x48] sm:$0xff]  ;;  %v84_v57 = vld [vmem:[%s1061_s4 + $0x40] sm:$0xff]  ;;  %v83_v60 = vld [vmem:[%s1061_s4 + $0x38] sm:$0xff] }
  0x2f   :  { %589 = vmatpush3.msra.mxu0 %v886_v7  ;;  %v107_v17 = vmul.f32 1.442695, %v106_v15  ;;  %v345_v32 = vsub.f32 0.0, %v344_v28  ;;  %v82_v63 = vld [vmem:[%s1061_s4 + $0x30] sm:$0xff]  ;;  %v77_v6 = vld [vmem:[%s1061_s4 + $0x8] sm:$0xff] }
  0x30   :  { %590 = vmatprep.subr.mxu0 %v802_v0  ;;  %v523_v8 = vld [vmem:[%s1062_s5 + $0x8] sm:$0xff] }
  0x31   :  { %591 = vmatpush3.msra.mxu0 %v894_v10  ;;  %701 = vpow2.f32 %v107_v17  ;;  %v346_v33 = vmul.f32 1.442695, %v345_v32 }
  0x32   :  { %592 = vmatprep.subr.mxu0 %v802_v0 }
  0x33   :  { %593 = vmatpush3.msra.mxu0 %v901_v12 }
  0x34   :  { %594 = vmatprep.subr.mxu0 %v802_v0 }
  0x35   :  { %595 = vmatpush3.msra.mxu0 %v908_v14 }
  0x36   :  { %596 = vmatprep.subr.mxu0 %v802_v0 }
  0x37   :  { %597 = vmatpush3.msra.mxu0 %v915_v16 }
  0x38   :  { %598 = vmatprep.subr.mxu0 %v802_v0 }
  0x39   :  { %599 = vmatpush3.msra.mxu0 %v66_v19 }
  0x3a   :  { %600 = vmatprep.subr.mxu0 %v802_v0 }
  0x3b   :  { %601 = vmatpush3.msra.mxu0 %v65_v20 }
  0x3c   :  { %602 = vmatprep.subr.mxu0 %v802_v0 }
  0x3d   :  { %603 = vmatpush3.msra.mxu0 %v64_v23 }
  0x3e   :  { %604 = vmatprep.subr.mxu0 %v802_v0  ;;  %v702_v30 = vpop.eup %701 }
  0x3f   :  { %605 = vmatpush3.msra.mxu0 %v63_v24  ;;  %v109_v31 = vadd.f32 1.0, %v702_v30 }
  0x40   :  { %606 = vmatprep.subr.mxu0 %v802_v0 }
  0x41   :  { %607 = vmatpush3.msra.mxu0 %v62_v26  ;;  %703 = vlog2.f32 %v109_v31 }
  0x42   :  { %608 = vmatprep.subr.mxu0 %v802_v0  ;;  %705 = vpow2.f32 %v346_v33 }
  0x43   :  { %609 = vmatpush3.msra.mxu0 %v61_v27 }
  0x44   :  { %610 = vmatprep.subr.mxu0 %v802_v0 }
  0x45   :  { %611 = vmatpush3.msra.mxu0 %v60_v29 }
  0x46   :  { %655 = vmatprep.subr.mxu0 %v802_v0 }
  0x4e   :  { %v704_v35 = vpop.eup %703 }
  0x4f   :  { %v111_v36 = vmul.f32 0.6931472, %v704_v35  ;;  %v706_v38 = vpop.eup %705 }
  0x50   :  { %v348_v39 = vadd.f32 1.0, %v706_v38 }
  0x51   :  { %v112_v37 = vadd.f32 %v111_v36, %v104_v34 }
  0x52   :  { %707 = vlog2.f32 %v348_v39 }
  0x53   :  { %613 = vmatmul.mubr.f32.vlgmr.msra.gmra.mxu0 %v112_v37 }
  0x54   :  { %656 = vmatpush3.msra.mxu0 %v858_v1  ;;  %687 = vmatprep.mubr.msk.f32.mxu0 %vm803_vm0, %v802_v0  ;;  %v81_v1 = vld [vmem:[%s1061_s4 + $0x28] sm:$0xff] }
  0x55   :  { %657 = vmatprep.subr.mxu0 %v802_v0 }
  0x56   :  { %658 = vmatpush3.msra.mxu0 %v863_v2  ;;  %v80_v2 = vld [vmem:[%s1061_s4 + $0x20] sm:$0xff] }
  0x57   :  { %659 = vmatprep.subr.mxu0 %v802_v0 }
  0x58   :  { %660 = vmatpush3.msra.mxu0 %v870_v3  ;;  %v79_v3 = vld [vmem:[%s1061_s4 + $0x18] sm:$0xff] }
  0x59   :  { %661 = vmatprep.subr.mxu0 %v802_v0 }
  0x5a   :  { %662 = vmatpush3.msra.mxu0 %v877_v4  ;;  %v78_v4 = vld [vmem:[%s1061_s4 + $0x10] sm:$0xff] }
  0x5b   :  { %663 = vmatprep.subr.mxu0 %v802_v0 }
  0x5c   :  { %664 = vmatpush3.msra.mxu0 %v886_v7  ;;  %v76_v7 = vld [vmem:[%s1061_s4] sm:$0xff]  ;;  %s804_s4 = smov [#allocation8]  }
  0x5d   :  { %665 = vmatprep.subr.mxu0 %v802_v0  ;;  %s508_s21 = sshll.u32 %s804_s4, 4  ;;  %s509_s21 = int_to_ptr.vmem [resolvable:$true] %s508_s21 }
  0x5e   :  { %666 = vmatpush3.msra.mxu0 %v894_v10  ;;  %s773_s5 = scalar_lea.vmem %s509_s21, 128  ;;  %p778_p2 = scmp.lt.s32.totalorder %s509_s21, %s509_s21 }
  0x5f   :  { %667 = vmatprep.subr.mxu0 %v802_v0  ;;  %v708_v40 = vpop.eup %707  ;;  %p774_p1 = scmp.ne.s32.totalorder %s509_s21, %s773_s5  ;;  %p779_p3 = scmp.lt.s32.totalorder %s773_s5, %s773_s5 }
  0x60   :  { %668 = vmatpush3.msra.mxu0 %v901_v12  ;;  %v350_v42 = vmul.f32 0.6931472, %v708_v40 }
  0x61   :  { %669 = vmatprep.subr.mxu0 %v802_v0  ;;  %p780_p4 = por %p779_p3, %p778_p2 }
  0x62   :  { %670 = vmatpush3.msra.mxu0 %v908_v14  ;;  %v351_v43 = vadd.f32 %v350_v42, %v343_v41 }
  0x63   :  { %671 = vmatprep.subr.mxu0 %v802_v0  ;;  %p781_p5 = pnand %p780_p4, %p774_p1 }
  0x64   :  { %672 = vmatpush3.msra.mxu0 %v915_v16 }
  0x65   :  { %673 = vmatprep.subr.mxu0 %v802_v0 }
  0x66   :  { %674 = vmatpush3.msra.mxu0 %v66_v19 }
  0x67   :  { %675 = vmatprep.subr.mxu0 %v802_v0 }
  0x68   :  { %676 = vmatpush3.msra.mxu0 %v65_v20 }
  0x69   :  { %677 = vmatprep.subr.mxu0 %v802_v0 }
  0x6a   :  { %678 = vmatpush3.msra.mxu0 %v64_v23 }
  0x6b   :  { %679 = vmatprep.subr.mxu0 %v802_v0 }
  0x6c   :  { %680 = vmatpush3.msra.mxu0 %v63_v24 }
  0x6d   :  { %681 = vmatprep.subr.mxu0 %v802_v0 }
  0x6e   :  { %682 = vmatpush3.msra.mxu0 %v62_v26 }
  0x6f   :  { %683 = vmatprep.subr.mxu0 %v802_v0 }
  0x70   :  { %684 = vmatpush3.msra.mxu0 %v61_v27 }
  0x71   :  { %685 = vmatprep.subr.mxu0 %v802_v0 }
  0x72   :  { %686 = vmatpush3.msra.mxu0 %v60_v29 }
  0x73   :  { %688 = vmatmul.mubr.f32.vlgmr.msra.gmra.mxu0 %v351_v43 }
 0x113   :  { %v179_v45 = vpop.f32.mrf.mxu0 }
 0x114   :  { %v183_v46 = vsub.f32 0.0, %v179_v45 }
 0x115   :  { %v614_v47 = vpop.f32.mrf.mxu0 }
 0x116   :  { %v184_v48 = vmul.f32 1.442695, %v183_v46 }
 0x118   :  { %709 = vpow2.f32 %v184_v48 }
 0x125   :  { %v710_v50 = vpop.eup %709 }
 0x126   :  { %618 = vmatmul.mubr.msk.f32.vlgmr.msra.gmra.mxu1 %vm187_vm1, %v710_v50 }
 0x127   :  { %621 = vmatpush3.msra.mxu1 %v91_v49  ;;  %652 = vmatprep.mubr.msk.f32.mxu1 %vm803_vm0, %v802_v0 }
 0x128   :  { %622 = vmatprep.subr.mxu1 %v802_v0 }
 0x129   :  { %623 = vmatpush3.msra.mxu1 %v90_v51 }
 0x12a   :  { %624 = vmatprep.subr.mxu1 %v802_v0 }
 0x12b   :  { %625 = vmatpush3.msra.mxu1 %v89_v52 }
 0x12c   :  { %626 = vmatprep.subr.mxu1 %v802_v0 }
 0x12d   :  { %627 = vmatpush3.msra.mxu1 %v88_v53 }
 0x12e   :  { %628 = vmatprep.subr.mxu1 %v802_v0 }
 0x12f   :  { %629 = vmatpush3.msra.mxu1 %v87_v54 }
 0x130   :  { %630 = vmatprep.subr.mxu1 %v802_v0 }
 0x131   :  { %631 = vmatpush3.msra.mxu1 %v86_v55 }
 0x132   :  { %632 = vmatprep.subr.mxu1 %v802_v0 }
 0x133   :  { %633 = vmatpush3.msra.mxu1 %v85_v56  ;;  %v418_v58 = vpop.f32.mrf.mxu0 }
 0x134   :  { %634 = vmatprep.subr.mxu1 %v802_v0  ;;  %v422_v59 = vsub.f32 0.0, %v418_v58 }
 0x135   :  { %635 = vmatpush3.msra.mxu1 %v84_v57  ;;  %v689_v61 = vpop.f32.mrf.mxu0 }
 0x136   :  { %636 = vmatprep.subr.mxu1 %v802_v0  ;;  %v423_v62 = vmul.f32 1.442695, %v422_v59 }
 0x137   :  { %637 = vmatpush3.msra.mxu1 %v83_v60 }
 0x138   :  { %638 = vmatprep.subr.mxu1 %v802_v0  ;;  %711 = vpow2.f32 %v423_v62 }
 0x139   :  { %639 = vmatpush3.msra.mxu1 %v82_v63 }
 0x13a   :  { %640 = vmatprep.subr.mxu1 %v802_v0 }
 0x13b   :  { %641 = vmatpush3.msra.mxu1 %v81_v1 }
 0x13c   :  { %642 = vmatprep.subr.mxu1 %v802_v0 }
 0x13d   :  { %643 = vmatpush3.msra.mxu1 %v80_v2 }
 0x13e   :  { %644 = vmatprep.subr.mxu1 %v802_v0 }
 0x13f   :  { %645 = vmatpush3.msra.mxu1 %v79_v3 }
 0x140   :  { %646 = vmatprep.subr.mxu1 %v802_v0 }
 0x141   :  { %647 = vmatpush3.msra.mxu1 %v78_v4 }
 0x142   :  { %648 = vmatprep.subr.mxu1 %v802_v0 }
 0x143   :  { %649 = vmatpush3.msra.mxu1 %v77_v6 }
 0x144   :  { %650 = vmatprep.subr.mxu1 %v802_v0 }
 0x145   :  { %651 = vmatpush3.msra.mxu1 %v76_v7  ;;  %v712_v9 = vpop.eup %711 }
 0x146   :  { %653 = vmatmul.mubr.f32.vlgmr.msra.gmra.mxu1 %v880_v5  ;;  %690 = vmatprep.subr.mxu1 %v802_v0 }
 0x147   :  { %691 = vmatpush3.msra.mxu1 %v523_v8  ;;  %692 = vmatprep.mubr.msk.f32.mxu1 %vm803_vm0, %v802_v0 }
 0x14a   :  { %693 = vmatmul.mubr.msk.f32.vlgmr.msra.gmra.mxu1 %vm187_vm1, %v712_v9 }
 0x1e6   :  { %v257_v10 = vpop.f32.mrf.mxu1 }
 0x1e8   :  { %v619_v11 = vpop.f32.mrf.mxu1 }
 0x206   :  { %v327_v12 = vpop.f32.mrf.mxu1 }
 0x207   :  { %v328_v14 = vadd.f32 %v327_v12, %v257_v10 }
 0x208   :  { %v654_v13 = vpop.f32.mrf.mxu1 }
 0x20a   :  { %v496_v15 = vpop.f32.mrf.mxu1 }
 0x20b   :  { %v500_v16 = vadd.f32 %v496_v15, %v328_v14 }
 0x20c   :  { %v694_v5 = vpop.f32.mrf.mxu1 }
 0x20d   :  { %501 = vst [vmem:[#allocation8] sm:$0xff] %v500_v16 }
 0x20e   :  { %784 = shalt.err (!%p781_p5)
}
 0x20f   :  { %511 = dma.vmem_to_hbm [thread:$0]  %s509_s21, 128, %s1063_s6, [#allocation4]  }
 0x210   :  { %797 = dma.done.wait [#allocation4], 128  }
 0x211   :  { %798 = vsyncadd [#allocation4], 4294967168 }
 0x212   :  { %515 = vsyncpa [#allocation3], 1 }
 0x213   :  { %516 = vsyncpa [#allocation6], 1 }
 0x214   :  { %517 = vsyncpa [#allocation4], 1 }

</bundles_post_ra>
